<compile_context>
chip_gen: v6e
topology: v6e:2x2x1
jax: 0.10.0
libtpu: 0.0.40
codegen_flags: <defaults>
</compile_context>

<pallas_src>
import math

import jax
import jax.numpy as jnp
from jax.experimental import pallas as pl
from jax.experimental.pallas import tpu as pltpu


def _round_up(x, m):
    return ((x + m - 1) // m) * m


def _pick_div_tile(total, pref):
    """Largest multiple of 128 that divides `total` (a multiple of 128) and
    is <= max(pref, 128)."""
    t = max(128, min(pref, total))
    t = (t // 128) * 128
    while total % t:
        t -= 128
    return t


def _conv_gemm_kernel(a_ref, b_ref, bias_ref, o_ref, acc_ref):
    # a: (tm, tk) im2col patch tile (bf16/f32)
    # b: (tk, tn) reshaped conv-weight tile
    # bias: (1, tn) f32
    # acc: (tm, tn) f32 VMEM accumulator, resident across the K grid axis.
    k = pl.program_id(2)

    @pl.when(k == 0)
    def _():
        acc_ref[...] = jnp.zeros_like(acc_ref)

    acc_ref[...] += jnp.dot(a_ref[...], b_ref[...],
                            preferred_element_type=jnp.float32)

    @pl.when(k == pl.num_programs(2) - 1)
    def _():
        o_ref[...] = (acc_ref[...] + bias_ref[...]).astype(o_ref.dtype)


def pruned_conv_forward_nhwc(x_nhwc, weight_oihw, bias, *, stride=1, padding=0,
                             compute_dtype=jnp.bfloat16,
                             tm=512, tn=256, tk=512,
                             vmem_budget_bytes=24 << 20):
    """Conv2d forward, NHWC in / NHWC out. Weight is OIHW, bias is (C_out,)."""
    N, H, W, C_in = x_nhwc.shape
    C_out, C_in_w, KH, KW = weight_oihw.shape
    assert C_in_w == C_in
    OH = (H + 2 * padding - KH) // stride + 1
    OW = (W + 2 * padding - KW) // stride + 1
    out_dtype = x_nhwc.dtype

    # ---- glue: cast early (halves the inflated im2col bytes), pad, im2col ----
    xc = x_nhwc.astype(compute_dtype)
    x_pad = jnp.pad(
        xc, ((0, 0), (padding, padding), (padding, padding), (0, 0)))
    patches = []
    for kh in range(KH):
        for kw in range(KW):
            patches.append(
                x_pad[:, kh:kh + stride * OH:stride,
                         kw:kw + stride * OW:stride, :])
    a = jnp.concatenate(patches, axis=-1).reshape(N * OH * OW, KH * KW * C_in)
    # TODO(synk): fully fusing the haloed patch extraction into the kernel
    # (manual DMA of overlapping x_pad row slabs) would remove this
    # HBM-materialized im2col copy; kept as plain-JAX glue for robustness.

    # weight OIHW -> (KH, KW, C_in, C_out) -> (K, C_out) to match patch order
    b = jnp.transpose(weight_oihw.astype(compute_dtype),
                      (2, 3, 1, 0)).reshape(KH * KW * C_in, C_out)

    M = N * OH * OW
    K = KH * KW * C_in

    # ---- lane-dense padding + generation-aware tile choice ----
    Kp = _round_up(K, 128)
    Np = _round_up(C_out, 128)

    csz = jnp.dtype(compute_dtype).itemsize
    osz = jnp.dtype(out_dtype).itemsize

    tm_t = min(tm, _round_up(M, 128))
    tn_t = _pick_div_tile(Np, tn)
    tk_t = _pick_div_tile(Kp, tk)

    def _footprint(tm_, tn_, tk_):
        # double-buffered inputs + double-buffered output + f32 accumulator
        return (2 * (tm_ * tk_ + tk_ * tn_) * csz
                + 2 * tm_ * tn_ * osz + tm_ * tn_ * 4 + 2 * tn_ * 4)

    # Shrink tiles until they fit the VMEM budget (safe for v7x 64 MiB parts).
    # Shrink the contraction tile first, then M, then N (keep output lane-wide).
    while (_footprint(tm_t, tn_t, tk_t) > vmem_budget_bytes
           and (tm_t > 128 or tn_t > 128 or tk_t > 128)):
        if tk_t > 128:
            tk_t = _pick_div_tile(Kp, tk_t - 128)
        elif tm_t > 128:
            tm_t = max(128, (tm_t // 2) // 128 * 128)
        else:
            tn_t = _pick_div_tile(Np, tn_t - 128)

    Mp = _round_up(M, tm_t)

    a = jnp.pad(a, ((0, Mp - M), (0, Kp - K)))
    b = jnp.pad(b, ((0, Kp - K), (0, Np - C_out)))
    bias2d = jnp.pad(bias.astype(jnp.float32).reshape(1, C_out),
                     ((0, 0), (0, Np - C_out)))

    flops = 2 * Mp * Kp * Np
    bytes_accessed = Mp * Kp * csz + Kp * Np * csz + Np * 4 + Mp * Np * osz
    vmem_limit = min(int(_footprint(tm_t, tn_t, tk_t) * 1.5) + (8 << 20),
                     48 << 20)

    out = pl.pallas_call(
        _conv_gemm_kernel,
        out_shape=jax.ShapeDtypeStruct((Mp, Np), out_dtype),
        grid_spec=pltpu.PrefetchScalarGridSpec(
            num_scalar_prefetch=0,
            grid=(Mp // tm_t, Np // tn_t, Kp // tk_t),
            in_specs=[
                pl.BlockSpec((tm_t, tk_t), lambda i, j, k: (i, k)),  # patches
                pl.BlockSpec((tk_t, tn_t), lambda i, j, k: (k, j)),  # weight
                pl.BlockSpec((1, tn_t), lambda i, j, k: (0, j)),     # bias
            ],
            out_specs=pl.BlockSpec((tm_t, tn_t), lambda i, j, k: (i, j)),
            scratch_shapes=[pltpu.VMEM((tm_t, tn_t), jnp.float32)],
        ),
        compiler_params=pltpu.CompilerParams(
            dimension_semantics=("parallel", "parallel", "arbitrary"),
            vmem_limit_bytes=vmem_limit),
        cost_estimate=pl.CostEstimate(flops=flops, transcendentals=0,
                                      bytes_accessed=int(bytes_accessed)),
    )(a, b, bias2d)

    return out[:M, :C_out].reshape(N, OH, OW, C_out)


def pruned_conv_forward(x_nchw, weight_oihw, bias, *, stride=1, padding=0,
                        **kwargs):
    """PyTorch-convention wrapper: NCHW in, NCHW out (adds two transposes;
    prefer pruned_conv_forward_nhwc if the surrounding model is NHWC)."""
    x_nhwc = jnp.transpose(x_nchw, (0, 2, 3, 1))
    out_nhwc = pruned_conv_forward_nhwc(x_nhwc, weight_oihw, bias,
                                        stride=stride, padding=padding,
                                        **kwargs)
    return jnp.transpose(out_nhwc, (0, 3, 1, 2))


if __name__ == "__main__":
    # Small shapes consistent with the module's forward (Conv2d on NCHW).
    N, C_in, H, W = 2, 4, 16, 16
    C_out, ksize, stride, padding = 8, 3, 1, 1

    key = jax.random.PRNGKey(0)
    k_w, k_b, k_x = jax.random.split(key, 3)

    # Deterministic init mirroring PrunedConv.__init__:
    #   weight ~ N(0, sqrt(2 / (n + m))),  n = k*k*C_out, m = k*k*C_in
    n = ksize * ksize * C_out
    m = ksize * ksize * C_in
    w_std = math.sqrt(2.0 / (n + m))
    weight = w_std * jax.random.normal(
        k_w, (C_out, C_in, ksize, ksize), jnp.float32)
    # Conv2d default bias init: U(-1/sqrt(fan_in), 1/sqrt(fan_in))
    fan_in = C_in * ksize * ksize
    bound = 1.0 / math.sqrt(fan_in)
    bias = jax.random.uniform(k_b, (C_out,), jnp.float32, -bound, bound)

    x = jax.random.normal(k_x, (N, C_in, H, W), jnp.float32)

    # XLA conv reference.
    ref = jax.lax.conv_general_dilated(
        x, weight, (stride, stride), [(padding, padding), (padding, padding)],
        dimension_numbers=("NCHW", "OIHW", "NCHW"),
    ) + bias.reshape(1, C_out, 1, 1)

    # f32-compute path: tight check of the GEMM plumbing / padding logic.
    out_f32 = pruned_conv_forward(x, weight, bias, stride=stride,
                                  padding=padding, compute_dtype=jnp.float32)
    out_f32 = jax.block_until_ready(out_f32)
    assert out_f32.shape == (N, C_out, H, W)
    assert float(jnp.max(jnp.abs(out_f32 - ref))) < 1e-4

    # Default bf16-operand / f32-accumulate path (looser tolerance).
    out_bf16 = pruned_conv_forward(x, weight, bias, stride=stride,
                                   padding=padding)
    out_bf16 = jax.block_until_ready(out_bf16)
    assert out_bf16.shape == (N, C_out, H, W)
    assert float(jnp.max(jnp.abs(out_bf16 - ref))) < 5e-2

    # TODO(synk): prune_by_percentage is a weight-mutation utility (bit-level
    # masking of stored weights), not part of the forward pass; not kernelized.
    print("KERNEL_OK")
</pallas_src>

<mosaic_0001>
module attributes {stable_mosaic.version = 11 : i64} {
  func.func @_conv_gemm_kernel(%arg0: i32, %arg1: i32, %arg2: i32, %arg3: memref<512x128xf32, #tpu.memory_space<vmem>>, %arg4: memref<128x128xf32, #tpu.memory_space<vmem>>, %arg5: memref<1x128xf32, #tpu.memory_space<vmem>>, %arg6: memref<512x128xf32, #tpu.memory_space<vmem>>, %arg7: memref<512x128xf32, #tpu.memory_space<vmem>>) attributes {dimension_semantics = [#tpu.dimension_semantics<parallel>, #tpu.dimension_semantics<parallel>, #tpu.dimension_semantics<arbitrary>], iteration_bounds = array<i64: 1, 1, 1>, scalar_prefetch = 0 : i64, scratch_operands = 1 : i64, tpu.core_type = #tpu.core_type<tc>, window_params = [{transform_indices = @transform_0, window_bounds = array<i64: 512, 128>}, {transform_indices = @transform_1, window_bounds = array<i64: 128, 128>}, {transform_indices = @transform_2, window_bounds = array<i64: 1, 128>}, {transform_indices = @transform_3, window_bounds = array<i64: 512, 128>}]} {
    %c0_i32 = arith.constant 0 : i32
    %0 = arith.cmpi eq, %arg2, %c0_i32 : i32
    %1 = arith.extui %0 : i1 to i32
    %c0_i32_0 = arith.constant 0 : i32
    %2 = arith.cmpi ne, %1, %c0_i32_0 : i32
    scf.if %2 {
      %cst_10 = arith.constant 0.000000e+00 : f32
      %12 = vector.broadcast %cst_10 : f32 to vector<512x128xf32>
      %c0_11 = arith.constant 0 : index
      %c0_12 = arith.constant 0 : index
      %13 = vector.load %arg7[%c0_11, %c0_12] : memref<512x128xf32, #tpu.memory_space<vmem>>, vector<512x128xf32>
      tpu.vector_store %arg7[%c0_11, %c0_12], %12 {strides = array<i32>} : memref<512x128xf32, #tpu.memory_space<vmem>>, vector<512x128xf32>,
    } else {
    }
    %c0 = arith.constant 0 : index
    %c0_1 = arith.constant 0 : index
    %3 = vector.load %arg7[%c0, %c0_1] : memref<512x128xf32, #tpu.memory_space<vmem>>, vector<512x128xf32>
    %c0_2 = arith.constant 0 : index
    %c0_3 = arith.constant 0 : index
    %4 = vector.load %arg3[%c0_2, %c0_3] : memref<512x128xf32, #tpu.memory_space<vmem>>, vector<512x128xf32>
    %c0_4 = arith.constant 0 : index
    %c0_5 = arith.constant 0 : index
    %5 = vector.load %arg4[%c0_4, %c0_5] : memref<128x128xf32, #tpu.memory_space<vmem>>, vector<128x128xf32>
    %cst = arith.constant dense<0.000000e+00> : vector<512x128xf32>
    %6 = tpu.matmul %4, %5, %cst {dimension_numbers = #tpu.dot_dimension_numbers<[1], [0], [0], [1], [0, 0, 1, 1], [], []>} : vector<512x128xf32>, vector<128x128xf32>, vector<512x128xf32> -> vector<512x128xf32>
    %7 = arith.addf %3, %6 : vector<512x128xf32>
    %c0_6 = arith.constant 0 : index
    %c0_7 = arith.constant 0 : index
    %8 = vector.load %arg7[%c0_6, %c0_7] : memref<512x128xf32, #tpu.memory_space<vmem>>, vector<512x128xf32>
    tpu.vector_store %arg7[%c0_6, %c0_7], %7 {strides = array<i32>} : memref<512x128xf32, #tpu.memory_space<vmem>>, vector<512x128xf32>,
    %c0_i32_8 = arith.constant 0 : i32
    %9 = arith.cmpi eq, %arg2, %c0_i32_8 : i32
    %10 = arith.extui %9 : i1 to i32
    %c0_i32_9 = arith.constant 0 : i32
    %11 = arith.cmpi ne, %10, %c0_i32_9 : i32
    scf.if %11 {
      %c0_10 = arith.constant 0 : index
      %c0_11 = arith.constant 0 : index
      %12 = vector.load %arg7[%c0_10, %c0_11] : memref<512x128xf32, #tpu.memory_space<vmem>>, vector<512x128xf32>
      %c0_12 = arith.constant 0 : index
      %c0_13 = arith.constant 0 : index
      %13 = vector.load %arg5[%c0_12, %c0_13] : memref<1x128xf32, #tpu.memory_space<vmem>>, vector<1x128xf32>
      %14 = vector.broadcast %13 : vector<1x128xf32> to vector<512x128xf32>
      %15 = arith.addf %12, %14 : vector<512x128xf32>
      %c0_14 = arith.constant 0 : index
      %c0_15 = arith.constant 0 : index
      %16 = vector.load %arg6[%c0_14, %c0_15] : memref<512x128xf32, #tpu.memory_space<vmem>>, vector<512x128xf32>
      tpu.vector_store %arg6[%c0_14, %c0_15], %15 {strides = array<i32>} : memref<512x128xf32, #tpu.memory_space<vmem>>, vector<512x128xf32>,
    } else {
    }
    return
  }
  func.func @transform_0(%arg0: i32, %arg1: i32, %arg2: i32) -> (i32, i32) {
    %c0_i32 = arith.constant 0 : i32
    return %arg0, %arg2 : i32, i32
  }
  func.func @transform_1(%arg0: i32, %arg1: i32, %arg2: i32) -> (i32, i32) {
    %c0_i32 = arith.constant 0 : i32
    return %arg2, %arg1 : i32, i32
  }
  func.func @transform_2(%arg0: i32, %arg1: i32, %arg2: i32) -> (i32, i32) {
    %c0_i32 = arith.constant 0 : i32
    %c0_i32_0 = arith.constant 0 : i32
    return %c0_i32, %arg1 : i32, i32
  }
  func.func @transform_3(%arg0: i32, %arg1: i32, %arg2: i32) -> (i32, i32) {
    %c0_i32 = arith.constant 0 : i32
    return %arg0, %arg1 : i32, i32
  }
}

</mosaic_0001>

<bundles_post_ra>
// kernel: tpu_custom_call.1
= control target key start
LH: loop header
LB: loop body
LE: loop exit
PB: predicated region body
PF: predicated region fallthrough
CT: control target
= control target key end

     0   :  { %8 = vsyncpa [#allocation4], 0  ;;  %s1412_s0 = inlined_call_operand.hbm [shape: f32[512,128], index: 0, kind: input, shape index: {}]   ;;  %s1413_s1 = inlined_call_operand.hbm [shape: f32[128,128], index: 1, kind: input, shape index: {}]   ;;  %s1414_s2 = inlined_call_operand.vmem [shape: f32[1,128], index: 2, kind: input, shape index: {}]   ;;  %s1415_s3 = inlined_call_operand.hbm [shape: f32[512,128], index: 3, kind: output, shape index: {}]  }
   0x1   :  { %9 = vsyncpa [#allocation7], 0 }
   0x2   :  { %10 = vsyncpa [#allocation5], 0  ;;  %s1300_s12 = smov [#allocation3]  }
   0x3   :  { %s16_s13 = sshll.u32 %s1300_s12, 4  ;;  %s17_s13 = int_to_ptr.vmem [resolvable:$true] %s16_s13 }
   0x4   :  { %s1242_s14 = scalar_lea.vmem %s17_s13, 8192  ;;  %p1247_p1 = scmp.lt.s32.totalorder %s17_s13, %s17_s13 }
   0x5   :  { %p1243_p0 = scmp.ne.s32.totalorder %s17_s13, %s1242_s14  ;;  %p1248_p2 = scmp.lt.s32.totalorder %s1242_s14, %s1242_s14 }
   0x7   :  { %p1249_p3 = por %p1248_p2, %p1247_p1 }
   0x9   :  { %p1250_p4 = pnand %p1249_p3, %p1243_p0 }
   0xb   :  { %1253 = shalt.err (!%p1250_p4)
}
   0xc   :  { %s1301_s15 = smov 128   ;;  %s1302_s16 = smov 8  }
   0xd   :  { %22 = dma.hbm_to_vmem [thread:$0]  %s1412_s0, 8192, %s17_s13, [#allocation4], %s1301_s15, %s1301_s15, %s1302_s16  }
   0xe   :  { %s1303_s19 = smov [#allocation6]  }
   0xf   :  { %s28_s20 = sshll.u32 %s1303_s19, 4  ;;  %s29_s20 = int_to_ptr.vmem [resolvable:$true] %s28_s20 }
  0x10   :  { %s1262_s21 = scalar_lea.vmem %s29_s20, 2048  ;;  %p1267_p6 = scmp.lt.s32.totalorder %s29_s20, %s29_s20 }
  0x11   :  { %p1263_p5 = scmp.ne.s32.totalorder %s29_s20, %s1262_s21  ;;  %p1268_p7 = scmp.lt.s32.totalorder %s1262_s21, %s1262_s21 }
  0x13   :  { %p1269_p8 = por %p1268_p7, %p1267_p6 }
  0x15   :  { %p1270_p9 = pnand %p1269_p8, %p1263_p5 }
  0x17   :  { %1273 = shalt.err (!%p1270_p9)
}
  0x18   :  { %34 = dma.hbm_to_vmem [thread:$0]  %s1413_s1, 2048, %s29_s20, [#allocation7], %s1301_s15, %s1301_s15, %s1302_s16  }
  0x19   :  { %1294 = dma.done.wait [#allocation4], 8192  }
  0x1a   :  { %1295 = vsyncadd [#allocation4], 4294959104 }
  0x1b   :  { %1296 = dma.done.wait [#allocation7], 2048  }
  0x1c   :  { %1297 = vsyncadd [#allocation7], 4294965248  ;;  %v254_v0 = vld [vmem:[#allocation6 + $0x78] sm:$0xff]  ;;  %v253_v1 = vld [vmem:[#allocation6 + $0x70] sm:$0xff] }
  0x1d   :  { %1069 = vmatprep.subr.mxu0 %v254_v0  ;;  %1197 = vmatprep.subr.mxu1 %v254_v0  ;;  %v252_v2 = vld [vmem:[#allocation6 + $0x68] sm:$0xff]  ;;  %v251_v3 = vld [vmem:[#allocation6 + $0x60] sm:$0xff]  ;;  %v250_v4 = vld [vmem:[#allocation6 + $0x58] sm:$0xff] }
  0x1e   :  { %1070 = vmatpush3.msra.mxu0 %v254_v0  ;;  %1213 = vmatpush3.msra.mxu1 %v254_v0  ;;  %v249_v5 = vld [vmem:[#allocation6 + $0x50] sm:$0xff]  ;;  %v248_v6 = vld [vmem:[#allocation6 + $0x48] sm:$0xff]  ;;  %v247_v7 = vld [vmem:[#allocation6 + $0x40] sm:$0xff] }
  0x1f   :  { %1071 = vmatprep.subr.mxu0 %v253_v1  ;;  %1198 = vmatprep.subr.mxu1 %v253_v1  ;;  %v246_v8 = vld [vmem:[#allocation6 + $0x38] sm:$0xff]  ;;  %v245_v9 = vld [vmem:[#allocation6 + $0x30] sm:$0xff]  ;;  %v244_v10 = vld [vmem:[#allocation6 + $0x28] sm:$0xff] }
  0x20   :  { %1072 = vmatpush3.msra.mxu0 %v253_v1  ;;  %1214 = vmatpush3.msra.mxu1 %v253_v1  ;;  %v243_v11 = vld [vmem:[#allocation6 + $0x20] sm:$0xff]  ;;  %v242_v12 = vld [vmem:[#allocation6 + $0x18] sm:$0xff]  ;;  %v241_v13 = vld [vmem:[#allocation6 + $0x10] sm:$0xff] }
  0x21   :  { %1073 = vmatprep.subr.mxu0 %v252_v2  ;;  %1199 = vmatprep.subr.mxu1 %v252_v2  ;;  %v240_v14 = vld [vmem:[#allocation6 + $0x8] sm:$0xff]  ;;  %v239_v15 = vld [vmem:[#allocation6] sm:$0xff]  ;;  %v177_v20 = vld [vmem:[#allocation3 + $0x10] sm:$0xff] }
  0x22   :  { %1074 = vmatpush3.msra.mxu0 %v252_v2  ;;  %1215 = vmatpush3.msra.mxu1 %v252_v2  ;;  %v175_v16 = vld [vmem:[#allocation3] sm:$0xff]  ;;  %v176_v18 = vld [vmem:[#allocation3 + $0x8] sm:$0xff]  ;;  %v209_v21 = vld [vmem:[#allocation3 + $0x110] sm:$0xff] }
  0x23   :  { %1075 = vmatprep.subr.mxu0 %v251_v3  ;;  %1200 = vmatprep.subr.mxu1 %v251_v3  ;;  %v207_v17 = vld [vmem:[#allocation3 + $0x100] sm:$0xff]  ;;  %v208_v19 = vld [vmem:[#allocation3 + $0x108] sm:$0xff]  ;;  %v178_v22 = vld [vmem:[#allocation3 + $0x18] sm:$0xff] }
  0x24   :  { %1076 = vmatpush3.msra.mxu0 %v251_v3  ;;  %1216 = vmatpush3.msra.mxu1 %v251_v3  ;;  %v210_v23 = vld [vmem:[#allocation3 + $0x118] sm:$0xff]  ;;  %v179_v24 = vld [vmem:[#allocation3 + $0x20] sm:$0xff]  ;;  %v180_v26 = vld [vmem:[#allocation3 + $0x28] sm:$0xff] }
  0x25   :  { %1077 = vmatprep.subr.mxu0 %v250_v4  ;;  %1201 = vmatprep.subr.mxu1 %v250_v4  ;;  %v211_v25 = vld [vmem:[#allocation3 + $0x120] sm:$0xff]  ;;  %v212_v27 = vld [vmem:[#allocation3 + $0x128] sm:$0xff]  ;;  %v181_v28 = vld [vmem:[#allocation3 + $0x30] sm:$0xff] }
  0x26   :  { %1078 = vmatpush3.msra.mxu0 %v250_v4  ;;  %1217 = vmatpush3.msra.mxu1 %v250_v4  ;;  %v213_v29 = vld [vmem:[#allocation3 + $0x130] sm:$0xff]  ;;  %v182_v30 = vld [vmem:[#allocation3 + $0x38] sm:$0xff]  ;;  %v183_v32 = vld [vmem:[#allocation3 + $0x40] sm:$0xff] }
  0x27   :  { %1079 = vmatprep.subr.mxu0 %v249_v5  ;;  %1202 = vmatprep.subr.mxu1 %v249_v5  ;;  %v214_v31 = vld [vmem:[#allocation3 + $0x138] sm:$0xff]  ;;  %v215_v33 = vld [vmem:[#allocation3 + $0x140] sm:$0xff]  ;;  %v184_v34 = vld [vmem:[#allocation3 + $0x48] sm:$0xff] }
  0x28   :  { %1080 = vmatpush3.msra.mxu0 %v249_v5  ;;  %1218 = vmatpush3.msra.mxu1 %v249_v5  ;;  %v216_v35 = vld [vmem:[#allocation3 + $0x148] sm:$0xff]  ;;  %v185_v36 = vld [vmem:[#allocation3 + $0x50] sm:$0xff]  ;;  %v186_v38 = vld [vmem:[#allocation3 + $0x58] sm:$0xff] }
  0x29   :  { %1081 = vmatprep.subr.mxu0 %v248_v6  ;;  %1203 = vmatprep.subr.mxu1 %v248_v6  ;;  %v217_v37 = vld [vmem:[#allocation3 + $0x150] sm:$0xff]  ;;  %v218_v39 = vld [vmem:[#allocation3 + $0x158] sm:$0xff]  ;;  %v187_v40 = vld [vmem:[#allocation3 + $0x60] sm:$0xff] }
  0x2a   :  { %1082 = vmatpush3.msra.mxu0 %v248_v6  ;;  %1219 = vmatpush3.msra.mxu1 %v248_v6  ;;  %v219_v41 = vld [vmem:[#allocation3 + $0x160] sm:$0xff]  ;;  %v188_v42 = vld [vmem:[#allocation3 + $0x68] sm:$0xff]  ;;  %v189_v44 = vld [vmem:[#allocation3 + $0x70] sm:$0xff] }
  0x2b   :  { %1083 = vmatprep.subr.mxu0 %v247_v7  ;;  %1204 = vmatprep.subr.mxu1 %v247_v7  ;;  %v220_v43 = vld [vmem:[#allocation3 + $0x168] sm:$0xff]  ;;  %v221_v45 = vld [vmem:[#allocation3 + $0x170] sm:$0xff]  ;;  %v190_v46 = vld [vmem:[#allocation3 + $0x78] sm:$0xff] }
  0x2c   :  { %1084 = vmatpush3.msra.mxu0 %v247_v7  ;;  %1220 = vmatpush3.msra.mxu1 %v247_v7  ;;  %v222_v47 = vld [vmem:[#allocation3 + $0x178] sm:$0xff]  ;;  %v191_v48 = vld [vmem:[#allocation3 + $0x80] sm:$0xff]  ;;  %v192_v50 = vld [vmem:[#allocation3 + $0x88] sm:$0xff] }
  0x2d   :  { %1085 = vmatprep.subr.mxu0 %v246_v8  ;;  %1205 = vmatprep.subr.mxu1 %v246_v8  ;;  %v223_v49 = vld [vmem:[#allocation3 + $0x180] sm:$0xff]  ;;  %v224_v51 = vld [vmem:[#allocation3 + $0x188] sm:$0xff]  ;;  %v193_v52 = vld [vmem:[#allocation3 + $0x90] sm:$0xff] }
  0x2e   :  { %1086 = vmatpush3.msra.mxu0 %v246_v8  ;;  %1221 = vmatpush3.msra.mxu1 %v246_v8  ;;  %v225_v53 = vld [vmem:[#allocation3 + $0x190] sm:$0xff]  ;;  %v194_v54 = vld [vmem:[#allocation3 + $0x98] sm:$0xff]  ;;  %v195_v56 = vld [vmem:[#allocation3 + $0xa0] sm:$0xff] }
  0x2f   :  { %1087 = vmatprep.subr.mxu0 %v245_v9  ;;  %1206 = vmatprep.subr.mxu1 %v245_v9  ;;  %v226_v55 = vld [vmem:[#allocation3 + $0x198] sm:$0xff]  ;;  %v227_v57 = vld [vmem:[#allocation3 + $0x1a0] sm:$0xff]  ;;  %v196_v58 = vld [vmem:[#allocation3 + $0xa8] sm:$0xff] }
  0x30   :  { %1088 = vmatpush3.msra.mxu0 %v245_v9  ;;  %1222 = vmatpush3.msra.mxu1 %v245_v9  ;;  %v228_v59 = vld [vmem:[#allocation3 + $0x1a8] sm:$0xff]  ;;  %v197_v60 = vld [vmem:[#allocation3 + $0xb0] sm:$0xff]  ;;  %v198_v62 = vld [vmem:[#allocation3 + $0xb8] sm:$0xff] }
  0x31   :  { %1089 = vmatprep.subr.mxu0 %v244_v10  ;;  %1207 = vmatprep.subr.mxu1 %v244_v10  ;;  %v229_v61 = vld [vmem:[#allocation3 + $0x1b0] sm:$0xff]  ;;  %v230_v63 = vld [vmem:[#allocation3 + $0x1b8] sm:$0xff]  ;;  %v199_v0 = vld [vmem:[#allocation3 + $0xc0] sm:$0xff] }
  0x32   :  { %1090 = vmatpush3.msra.mxu0 %v244_v10  ;;  %1223 = vmatpush3.msra.mxu1 %v244_v10  ;;  %v231_v1 = vld [vmem:[#allocation3 + $0x1c0] sm:$0xff]  ;;  %v200_v2 = vld [vmem:[#allocation3 + $0xc8] sm:$0xff]  ;;  %v201_v4 = vld [vmem:[#allocation3 + $0xd0] sm:$0xff] }
  0x33   :  { %1091 = vmatprep.subr.mxu0 %v243_v11  ;;  %1208 = vmatprep.subr.mxu1 %v243_v11  ;;  %v232_v3 = vld [vmem:[#allocation3 + $0x1c8] sm:$0xff]  ;;  %v233_v5 = vld [vmem:[#allocation3 + $0x1d0] sm:$0xff]  ;;  %v202_v6 = vld [vmem:[#allocation3 + $0xd8] sm:$0xff] }
  0x34   :  { %1092 = vmatpush3.msra.mxu0 %v243_v11  ;;  %1224 = vmatpush3.msra.mxu1 %v243_v11  ;;  %v234_v7 = vld [vmem:[#allocation3 + $0x1d8] sm:$0xff]  ;;  %v203_v8 = vld [vmem:[#allocation3 + $0xe0] sm:$0xff]  ;;  %v204_v10 = vld [vmem:[#allocation3 + $0xe8] sm:$0xff] }
  0x35   :  { %1093 = vmatprep.subr.mxu0 %v242_v12  ;;  %1209 = vmatprep.subr.mxu1 %v242_v12  ;;  %v235_v9 = vld [vmem:[#allocation3 + $0x1e0] sm:$0xff]  ;;  %v236_v11 = vld [vmem:[#allocation3 + $0x1e8] sm:$0xff] }
  0x36   :  { %1094 = vmatpush3.msra.mxu0 %v242_v12  ;;  %1225 = vmatpush3.msra.mxu1 %v242_v12  ;;  %v205_v12 = vld [vmem:[#allocation3 + $0xf0] sm:$0xff] }
  0x37   :  { %1095 = vmatprep.subr.mxu0 %v241_v13  ;;  %1210 = vmatprep.subr.mxu1 %v241_v13 }
  0x38   :  { %1096 = vmatpush3.msra.mxu0 %v241_v13  ;;  %1226 = vmatpush3.msra.mxu1 %v241_v13  ;;  %v237_v13 = vld [vmem:[#allocation3 + $0x1f0] sm:$0xff] }
  0x39   :  { %1097 = vmatprep.subr.mxu0 %v240_v14  ;;  %1211 = vmatprep.subr.mxu1 %v240_v14 }
  0x3a   :  { %1098 = vmatpush3.msra.mxu0 %v240_v14  ;;  %1227 = vmatpush3.msra.mxu1 %v240_v14  ;;  %v206_v14 = vld [vmem:[#allocation3 + $0xf8] sm:$0xff] }
  0x3b   :  { %1099 = vmatprep.subr.mxu0 %v239_v15  ;;  %1212 = vmatprep.subr.mxu1 %v239_v15 }
  0x3c   :  { %1100 = vmatpush3.msra.mxu0 %v239_v15  ;;  %1228 = vmatpush3.msra.mxu1 %v239_v15  ;;  %v238_v15 = vld [vmem:[#allocation3 + $0x1f8] sm:$0xff] }
  0x3d   :  { %1101 = vmatprep.mubr.f32.mxu0 %v175_v16  ;;  %1149 = vmatprep.mubr.f32.mxu1 %v207_v17  ;;  %v1340_v16 = vld [vmem:[%s1414_s2] ss:$0 sm:$0xff]  ;;  %s1304_s2 = smov [#allocation8]  }
  0x3e   :  { %1102 = vmatmul.mubr.f32.vlgmr.msra.gmra.mxu0 %v176_v18  ;;  %1150 = vmatmul.mubr.f32.vlgmr.msra.gmra.mxu1 %v208_v19  ;;  %s975_s24 = sshll.u32 %s1304_s2, 4  ;;  %s976_s24 = int_to_ptr.vmem [resolvable:$true] %s975_s24 }
  0x3f   :  { %1104 = vmatprep.mubr.f32.mxu0 %v177_v20  ;;  %1152 = vmatprep.mubr.f32.mxu1 %v209_v21  ;;  %s1274_s25 = scalar_lea.vmem %s976_s24, 8192  ;;  %p1279_p11 = scmp.lt.s32.totalorder %s976_s24, %s976_s24 }
  0x40   :  { %p1275_p10 = scmp.ne.s32.totalorder %s976_s24, %s1274_s25  ;;  %p1280_p12 = scmp.lt.s32.totalorder %s1274_s25, %s1274_s25 }
  0x42   :  { %1105 = vmatmul.mubr.f32.gmra.mxu0 %v178_v22  ;;  %1153 = vmatmul.mubr.f32.gmra.mxu1 %v210_v23  ;;  %p1281_p13 = por %p1280_p12, %p1279_p11 }
  0x43   :  { %1107 = vmatprep.mubr.f32.mxu0 %v179_v24  ;;  %1155 = vmatprep.mubr.f32.mxu1 %v211_v25 }
  0x44   :  { %p1282_p0 = pnand %p1281_p13, %p1275_p10 }
  0x46   :  { %1108 = vmatmul.mubr.f32.gmra.mxu0 %v180_v26  ;;  %1156 = vmatmul.mubr.f32.gmra.mxu1 %v212_v27 }
  0x47   :  { %1110 = vmatprep.mubr.f32.mxu0 %v181_v28  ;;  %1158 = vmatprep.mubr.f32.mxu1 %v213_v29 }
  0x4a   :  { %1111 = vmatmul.mubr.f32.gmra.mxu0 %v182_v30  ;;  %1159 = vmatmul.mubr.f32.gmra.mxu1 %v214_v31 }
  0x4b   :  { %1113 = vmatprep.mubr.f32.mxu0 %v183_v32  ;;  %1161 = vmatprep.mubr.f32.mxu1 %v215_v33 }
  0x4e   :  { %1114 = vmatmul.mubr.f32.gmra.mxu0 %v184_v34  ;;  %1162 = vmatmul.mubr.f32.gmra.mxu1 %v216_v35 }
  0x4f   :  { %1116 = vmatprep.mubr.f32.mxu0 %v185_v36  ;;  %1164 = vmatprep.mubr.f32.mxu1 %v217_v37 }
  0x52   :  { %1117 = vmatmul.mubr.f32.gmra.mxu0 %v186_v38  ;;  %1165 = vmatmul.mubr.f32.gmra.mxu1 %v218_v39 }
  0x53   :  { %1119 = vmatprep.mubr.f32.mxu0 %v187_v40  ;;  %1167 = vmatprep.mubr.f32.mxu1 %v219_v41 }
  0x56   :  { %1120 = vmatmul.mubr.f32.gmra.mxu0 %v188_v42  ;;  %1168 = vmatmul.mubr.f32.gmra.mxu1 %v220_v43 }
  0x57   :  { %1122 = vmatprep.mubr.f32.mxu0 %v189_v44  ;;  %1170 = vmatprep.mubr.f32.mxu1 %v221_v45 }
  0x5a   :  { %1123 = vmatmul.mubr.f32.gmra.mxu0 %v190_v46  ;;  %1171 = vmatmul.mubr.f32.gmra.mxu1 %v222_v47 }
  0x5b   :  { %1125 = vmatprep.mubr.f32.mxu0 %v191_v48  ;;  %1173 = vmatprep.mubr.f32.mxu1 %v223_v49 }
  0x5e   :  { %1126 = vmatmul.mubr.f32.gmra.mxu0 %v192_v50  ;;  %1174 = vmatmul.mubr.f32.gmra.mxu1 %v224_v51 }
  0x5f   :  { %1128 = vmatprep.mubr.f32.mxu0 %v193_v52  ;;  %1176 = vmatprep.mubr.f32.mxu1 %v225_v53 }
  0x62   :  { %1129 = vmatmul.mubr.f32.gmra.mxu0 %v194_v54  ;;  %1177 = vmatmul.mubr.f32.gmra.mxu1 %v226_v55 }
  0x63   :  { %1131 = vmatprep.mubr.f32.mxu0 %v195_v56  ;;  %1179 = vmatprep.mubr.f32.mxu1 %v227_v57 }
  0x66   :  { %1132 = vmatmul.mubr.f32.gmra.mxu0 %v196_v58  ;;  %1180 = vmatmul.mubr.f32.gmra.mxu1 %v228_v59 }
  0x67   :  { %1134 = vmatprep.mubr.f32.mxu0 %v197_v60  ;;  %1182 = vmatprep.mubr.f32.mxu1 %v229_v61 }
  0x6a   :  { %1135 = vmatmul.mubr.f32.gmra.mxu0 %v198_v62  ;;  %1183 = vmatmul.mubr.f32.gmra.mxu1 %v230_v63 }
  0x6b   :  { %1137 = vmatprep.mubr.f32.mxu0 %v199_v0  ;;  %1185 = vmatprep.mubr.f32.mxu1 %v231_v1 }
  0x6e   :  { %1138 = vmatmul.mubr.f32.gmra.mxu0 %v200_v2  ;;  %1186 = vmatmul.mubr.f32.gmra.mxu1 %v232_v3 }
  0x6f   :  { %1140 = vmatprep.mubr.f32.mxu0 %v201_v4  ;;  %1188 = vmatprep.mubr.f32.mxu1 %v233_v5 }
  0x72   :  { %1141 = vmatmul.mubr.f32.gmra.mxu0 %v202_v6  ;;  %1189 = vmatmul.mubr.f32.gmra.mxu1 %v234_v7 }
  0x73   :  { %1143 = vmatprep.mubr.f32.mxu0 %v203_v8  ;;  %1191 = vmatprep.mubr.f32.mxu1 %v235_v9 }
  0x76   :  { %1144 = vmatmul.mubr.f32.gmra.mxu0 %v204_v10  ;;  %1192 = vmatmul.mubr.f32.gmra.mxu1 %v236_v11 }
  0x77   :  { %1146 = vmatprep.mubr.f32.mxu0 %v205_v12  ;;  %1194 = vmatprep.mubr.f32.mxu1 %v237_v13 }
  0x7a   :  { %1147 = vmatmul.mubr.f32.gmra.mxu0 %v206_v14  ;;  %1195 = vmatmul.mubr.f32.gmra.mxu1 %v238_v15 }
  0xfe   :  { %v1103_v17 = vpop.f32.mrf.mxu0  ;;  %v1151_v18 = vpop.f32.mrf.mxu1 }
  0xff   :  { %v843_v19 = vadd.f32 %v1103_v17, %v1340_v16  ;;  %v875_v20 = vadd.f32 %v1151_v18, %v1340_v16 }
 0x100   :  { %v321_v21 = vpop.f32.mrf.mxu0  ;;  %v481_v22 = vpop.f32.mrf.mxu1 }
 0x101   :  { %907 = vst [vmem:[#allocation8 + $0x8] sm:$0xff] %v843_v19  ;;  %939 = vst [vmem:[#allocation8 + $0x108] sm:$0xff] %v875_v20  ;;  %v842_v23 = vadd.f32 %v1340_v16, %v321_v21  ;;  %v874_v24 = vadd.f32 %v1340_v16, %v481_v22 }
 0x102   :  { %v1106_v25 = vpop.f32.mrf.mxu0  ;;  %v1154_v26 = vpop.f32.mrf.mxu1 }
 0x103   :  { %906 = vst [vmem:[#allocation8] sm:$0xff] %v842_v23  ;;  %938 = vst [vmem:[#allocation8 + $0x100] sm:$0xff] %v874_v24  ;;  %v845_v27 = vadd.f32 %v1106_v25, %v1340_v16  ;;  %v877_v28 = vadd.f32 %v1154_v26, %v1340_v16 }
 0x104   :  { %v331_v29 = vpop.f32.mrf.mxu0  ;;  %v491_v30 = vpop.f32.mrf.mxu1 }
 0x105   :  { %909 = vst [vmem:[#allocation8 + $0x18] sm:$0xff] %v845_v27  ;;  %941 = vst [vmem:[#allocation8 + $0x118] sm:$0xff] %v877_v28  ;;  %v844_v31 = vadd.f32 %v1340_v16, %v331_v29  ;;  %v876_v32 = vadd.f32 %v1340_v16, %v491_v30 }
 0x106   :  { %v1109_v33 = vpop.f32.mrf.mxu0  ;;  %v1157_v34 = vpop.f32.mrf.mxu1 }
 0x107   :  { %908 = vst [vmem:[#allocation8 + $0x10] sm:$0xff] %v844_v31  ;;  %940 = vst [vmem:[#allocation8 + $0x110] sm:$0xff] %v876_v32  ;;  %v847_v35 = vadd.f32 %v1109_v33, %v1340_v16  ;;  %v879_v36 = vadd.f32 %v1157_v34, %v1340_v16 }
 0x108   :  { %v341_v37 = vpop.f32.mrf.mxu0  ;;  %v501_v38 = vpop.f32.mrf.mxu1 }
 0x109   :  { %911 = vst [vmem:[#allocation8 + $0x28] sm:$0xff] %v847_v35  ;;  %943 = vst [vmem:[#allocation8 + $0x128] sm:$0xff] %v879_v36  ;;  %v846_v39 = vadd.f32 %v1340_v16, %v341_v37  ;;  %v878_v40 = vadd.f32 %v1340_v16, %v501_v38 }
 0x10a   :  { %v1112_v41 = vpop.f32.mrf.mxu0  ;;  %v1160_v42 = vpop.f32.mrf.mxu1 }
 0x10b   :  { %910 = vst [vmem:[#allocation8 + $0x20] sm:$0xff] %v846_v39  ;;  %942 = vst [vmem:[#allocation8 + $0x120] sm:$0xff] %v878_v40  ;;  %v849_v43 = vadd.f32 %v1112_v41, %v1340_v16  ;;  %v881_v44 = vadd.f32 %v1160_v42, %v1340_v16 }
 0x10c   :  { %v351_v45 = vpop.f32.mrf.mxu0  ;;  %v511_v46 = vpop.f32.mrf.mxu1 }
 0x10d   :  { %913 = vst [vmem:[#allocation8 + $0x38] sm:$0xff] %v849_v43  ;;  %945 = vst [vmem:[#allocation8 + $0x138] sm:$0xff] %v881_v44  ;;  %v848_v47 = vadd.f32 %v1340_v16, %v351_v45  ;;  %v880_v48 = vadd.f32 %v1340_v16, %v511_v46 }
 0x10e   :  { %v1115_v49 = vpop.f32.mrf.mxu0  ;;  %v1163_v50 = vpop.f32.mrf.mxu1 }
 0x10f   :  { %912 = vst [vmem:[#allocation8 + $0x30] sm:$0xff] %v848_v47  ;;  %944 = vst [vmem:[#allocation8 + $0x130] sm:$0xff] %v880_v48  ;;  %v851_v51 = vadd.f32 %v1115_v49, %v1340_v16  ;;  %v883_v52 = vadd.f32 %v1163_v50, %v1340_v16 }
 0x110   :  { %v361_v53 = vpop.f32.mrf.mxu0  ;;  %v521_v54 = vpop.f32.mrf.mxu1 }
 0x111   :  { %915 = vst [vmem:[#allocation8 + $0x48] sm:$0xff] %v851_v51  ;;  %947 = vst [vmem:[#allocation8 + $0x148] sm:$0xff] %v883_v52  ;;  %v850_v55 = vadd.f32 %v1340_v16, %v361_v53  ;;  %v882_v56 = vadd.f32 %v1340_v16, %v521_v54 }
 0x112   :  { %v1118_v57 = vpop.f32.mrf.mxu0  ;;  %v1166_v58 = vpop.f32.mrf.mxu1 }
 0x113   :  { %914 = vst [vmem:[#allocation8 + $0x40] sm:$0xff] %v850_v55  ;;  %946 = vst [vmem:[#allocation8 + $0x140] sm:$0xff] %v882_v56  ;;  %v853_v59 = vadd.f32 %v1118_v57, %v1340_v16  ;;  %v885_v60 = vadd.f32 %v1166_v58, %v1340_v16 }
 0x114   :  { %v371_v61 = vpop.f32.mrf.mxu0  ;;  %v531_v62 = vpop.f32.mrf.mxu1 }
 0x115   :  { %917 = vst [vmem:[#allocation8 + $0x58] sm:$0xff] %v853_v59  ;;  %949 = vst [vmem:[#allocation8 + $0x158] sm:$0xff] %v885_v60  ;;  %v852_v63 = vadd.f32 %v1340_v16, %v371_v61  ;;  %v884_v0 = vadd.f32 %v1340_v16, %v531_v62 }
 0x116   :  { %v1121_v1 = vpop.f32.mrf.mxu0  ;;  %v1169_v2 = vpop.f32.mrf.mxu1 }
 0x117   :  { %916 = vst [vmem:[#allocation8 + $0x50] sm:$0xff] %v852_v63  ;;  %948 = vst [vmem:[#allocation8 + $0x150] sm:$0xff] %v884_v0  ;;  %v855_v3 = vadd.f32 %v1121_v1, %v1340_v16  ;;  %v887_v4 = vadd.f32 %v1169_v2, %v1340_v16 }
 0x118   :  { %v381_v5 = vpop.f32.mrf.mxu0  ;;  %v541_v6 = vpop.f32.mrf.mxu1 }
 0x119   :  { %919 = vst [vmem:[#allocation8 + $0x68] sm:$0xff] %v855_v3  ;;  %951 = vst [vmem:[#allocation8 + $0x168] sm:$0xff] %v887_v4  ;;  %v854_v7 = vadd.f32 %v1340_v16, %v381_v5  ;;  %v886_v8 = vadd.f32 %v1340_v16, %v541_v6 }
 0x11a   :  { %v1124_v9 = vpop.f32.mrf.mxu0  ;;  %v1172_v10 = vpop.f32.mrf.mxu1 }
 0x11b   :  { %918 = vst [vmem:[#allocation8 + $0x60] sm:$0xff] %v854_v7  ;;  %950 = vst [vmem:[#allocation8 + $0x160] sm:$0xff] %v886_v8  ;;  %v857_v11 = vadd.f32 %v1124_v9, %v1340_v16  ;;  %v889_v12 = vadd.f32 %v1172_v10, %v1340_v16 }
 0x11c   :  { %v391_v13 = vpop.f32.mrf.mxu0  ;;  %v551_v14 = vpop.f32.mrf.mxu1 }
 0x11d   :  { %921 = vst [vmem:[#allocation8 + $0x78] sm:$0xff] %v857_v11  ;;  %953 = vst [vmem:[#allocation8 + $0x178] sm:$0xff] %v889_v12  ;;  %v856_v15 = vadd.f32 %v1340_v16, %v391_v13  ;;  %v888_v17 = vadd.f32 %v1340_v16, %v551_v14 }
 0x11e   :  { %v1127_v18 = vpop.f32.mrf.mxu0  ;;  %v1175_v19 = vpop.f32.mrf.mxu1 }
 0x11f   :  { %920 = vst [vmem:[#allocation8 + $0x70] sm:$0xff] %v856_v15  ;;  %952 = vst [vmem:[#allocation8 + $0x170] sm:$0xff] %v888_v17  ;;  %v859_v20 = vadd.f32 %v1127_v18, %v1340_v16  ;;  %v891_v21 = vadd.f32 %v1175_v19, %v1340_v16 }
 0x120   :  { %v401_v22 = vpop.f32.mrf.mxu0  ;;  %v561_v23 = vpop.f32.mrf.mxu1 }
 0x121   :  { %923 = vst [vmem:[#allocation8 + $0x88] sm:$0xff] %v859_v20  ;;  %955 = vst [vmem:[#allocation8 + $0x188] sm:$0xff] %v891_v21  ;;  %v858_v24 = vadd.f32 %v1340_v16, %v401_v22  ;;  %v890_v25 = vadd.f32 %v1340_v16, %v561_v23 }
 0x122   :  { %v1130_v26 = vpop.f32.mrf.mxu0  ;;  %v1178_v27 = vpop.f32.mrf.mxu1 }
 0x123   :  { %922 = vst [vmem:[#allocation8 + $0x80] sm:$0xff] %v858_v24  ;;  %954 = vst [vmem:[#allocation8 + $0x180] sm:$0xff] %v890_v25  ;;  %v861_v28 = vadd.f32 %v1130_v26, %v1340_v16  ;;  %v893_v29 = vadd.f32 %v1178_v27, %v1340_v16 }
 0x124   :  { %v411_v30 = vpop.f32.mrf.mxu0  ;;  %v571_v31 = vpop.f32.mrf.mxu1 }
 0x125   :  { %925 = vst [vmem:[#allocation8 + $0x98] sm:$0xff] %v861_v28  ;;  %957 = vst [vmem:[#allocation8 + $0x198] sm:$0xff] %v893_v29  ;;  %v860_v32 = vadd.f32 %v1340_v16, %v411_v30  ;;  %v892_v33 = vadd.f32 %v1340_v16, %v571_v31 }
 0x126   :  { %v1133_v34 = vpop.f32.mrf.mxu0  ;;  %v1181_v35 = vpop.f32.mrf.mxu1 }
 0x127   :  { %924 = vst [vmem:[#allocation8 + $0x90] sm:$0xff] %v860_v32  ;;  %956 = vst [vmem:[#allocation8 + $0x190] sm:$0xff] %v892_v33  ;;  %v863_v36 = vadd.f32 %v1133_v34, %v1340_v16  ;;  %v895_v37 = vadd.f32 %v1181_v35, %v1340_v16 }
 0x128   :  { %v421_v38 = vpop.f32.mrf.mxu0  ;;  %v581_v39 = vpop.f32.mrf.mxu1 }
 0x129   :  { %927 = vst [vmem:[#allocation8 + $0xa8] sm:$0xff] %v863_v36  ;;  %959 = vst [vmem:[#allocation8 + $0x1a8] sm:$0xff] %v895_v37  ;;  %v862_v40 = vadd.f32 %v1340_v16, %v421_v38  ;;  %v894_v41 = vadd.f32 %v1340_v16, %v581_v39 }
 0x12a   :  { %v1136_v42 = vpop.f32.mrf.mxu0  ;;  %v1184_v43 = vpop.f32.mrf.mxu1 }
 0x12b   :  { %926 = vst [vmem:[#allocation8 + $0xa0] sm:$0xff] %v862_v40  ;;  %958 = vst [vmem:[#allocation8 + $0x1a0] sm:$0xff] %v894_v41  ;;  %v865_v44 = vadd.f32 %v1136_v42, %v1340_v16  ;;  %v897_v45 = vadd.f32 %v1184_v43, %v1340_v16 }
 0x12c   :  { %v431_v46 = vpop.f32.mrf.mxu0  ;;  %v591_v47 = vpop.f32.mrf.mxu1 }
 0x12d   :  { %929 = vst [vmem:[#allocation8 + $0xb8] sm:$0xff] %v865_v44  ;;  %961 = vst [vmem:[#allocation8 + $0x1b8] sm:$0xff] %v897_v45  ;;  %v864_v48 = vadd.f32 %v1340_v16, %v431_v46  ;;  %v896_v49 = vadd.f32 %v1340_v16, %v591_v47 }
 0x12e   :  { %v1139_v50 = vpop.f32.mrf.mxu0  ;;  %v1187_v51 = vpop.f32.mrf.mxu1 }
 0x12f   :  { %928 = vst [vmem:[#allocation8 + $0xb0] sm:$0xff] %v864_v48  ;;  %960 = vst [vmem:[#allocation8 + $0x1b0] sm:$0xff] %v896_v49  ;;  %v867_v52 = vadd.f32 %v1139_v50, %v1340_v16  ;;  %v899_v53 = vadd.f32 %v1187_v51, %v1340_v16 }
 0x130   :  { %v441_v54 = vpop.f32.mrf.mxu0  ;;  %v601_v55 = vpop.f32.mrf.mxu1 }
 0x131   :  { %931 = vst [vmem:[#allocation8 + $0xc8] sm:$0xff] %v867_v52  ;;  %963 = vst [vmem:[#allocation8 + $0x1c8] sm:$0xff] %v899_v53  ;;  %v866_v56 = vadd.f32 %v1340_v16, %v441_v54  ;;  %v898_v57 = vadd.f32 %v1340_v16, %v601_v55 }
 0x132   :  { %v1142_v58 = vpop.f32.mrf.mxu0  ;;  %v1190_v59 = vpop.f32.mrf.mxu1 }
 0x133   :  { %930 = vst [vmem:[#allocation8 + $0xc0] sm:$0xff] %v866_v56  ;;  %962 = vst [vmem:[#allocation8 + $0x1c0] sm:$0xff] %v898_v57  ;;  %v869_v60 = vadd.f32 %v1142_v58, %v1340_v16  ;;  %v901_v61 = vadd.f32 %v1190_v59, %v1340_v16 }
 0x134   :  { %v451_v62 = vpop.f32.mrf.mxu0  ;;  %v611_v63 = vpop.f32.mrf.mxu1 }
 0x135   :  { %933 = vst [vmem:[#allocation8 + $0xd8] sm:$0xff] %v869_v60  ;;  %965 = vst [vmem:[#allocation8 + $0x1d8] sm:$0xff] %v901_v61  ;;  %v868_v0 = vadd.f32 %v1340_v16, %v451_v62  ;;  %v900_v1 = vadd.f32 %v1340_v16, %v611_v63 }
 0x136   :  { %v1145_v2 = vpop.f32.mrf.mxu0  ;;  %v1193_v3 = vpop.f32.mrf.mxu1 }
 0x137   :  { %932 = vst [vmem:[#allocation8 + $0xd0] sm:$0xff] %v868_v0  ;;  %964 = vst [vmem:[#allocation8 + $0x1d0] sm:$0xff] %v900_v1  ;;  %v871_v4 = vadd.f32 %v1145_v2, %v1340_v16  ;;  %v903_v5 = vadd.f32 %v1193_v3, %v1340_v16 }
 0x138   :  { %v461_v6 = vpop.f32.mrf.mxu0  ;;  %v621_v7 = vpop.f32.mrf.mxu1 }
 0x139   :  { %935 = vst [vmem:[#allocation8 + $0xe8] sm:$0xff] %v871_v4  ;;  %967 = vst [vmem:[#allocation8 + $0x1e8] sm:$0xff] %v903_v5  ;;  %v870_v8 = vadd.f32 %v1340_v16, %v461_v6  ;;  %v902_v9 = vadd.f32 %v1340_v16, %v621_v7 }
 0x13a   :  { %v1148_v10 = vpop.f32.mrf.mxu0  ;;  %v1196_v11 = vpop.f32.mrf.mxu1 }
 0x13b   :  { %934 = vst [vmem:[#allocation8 + $0xe0] sm:$0xff] %v870_v8  ;;  %966 = vst [vmem:[#allocation8 + $0x1e0] sm:$0xff] %v902_v9  ;;  %v873_v12 = vadd.f32 %v1148_v10, %v1340_v16  ;;  %v905_v13 = vadd.f32 %v1196_v11, %v1340_v16 }
 0x13c   :  { %v471_v14 = vpop.f32.mrf.mxu0  ;;  %v631_v15 = vpop.f32.mrf.mxu1 }
 0x13d   :  { %937 = vst [vmem:[#allocation8 + $0xf8] sm:$0xff] %v873_v12  ;;  %969 = vst [vmem:[#allocation8 + $0x1f8] sm:$0xff] %v905_v13  ;;  %v872_v17 = vadd.f32 %v1340_v16, %v471_v14  ;;  %v904_v18 = vadd.f32 %v1340_v16, %v631_v15 }
 0x13f   :  { %936 = vst [vmem:[#allocation8 + $0xf0] sm:$0xff] %v872_v17  ;;  %968 = vst [vmem:[#allocation8 + $0x1f0] sm:$0xff] %v904_v18 }
 0x140   :  { %1285 = shalt.err (!%p1282_p0)
}
 0x141   :  { %981 = dma.vmem_to_hbm [thread:$0]  %s976_s24, 8192, %s1415_s3, [#allocation5], %s1301_s15, %s1301_s15, %s1302_s16  }
 0x142   :  { %1298 = dma.done.wait [#allocation5], 8192  }
 0x143   :  { %1299 = vsyncadd [#allocation5], 4294959104 }
 0x144   :  { %985 = vsyncpa [#allocation4], 1 }
 0x145   :  { %986 = vsyncpa [#allocation7], 1 }
 0x146   :  { %987 = vsyncpa [#allocation5], 1 }

</bundles_post_ra>
